<compile_context>
chip_gen: v6e
topology: v6e:2x2x1
jax: 0.10.0
libtpu: 0.0.40
codegen_flags: <defaults>
</compile_context>

<pallas_src>
import functools

import jax
import jax.numpy as jnp
from jax.experimental import pallas as pl
from jax.experimental.pallas import tpu as pltpu

LANE = 128
SUBLANE = 8


def _round_up(n, m):
    return ((n + m - 1) // m) * m


def _cdiv(a, b):
    return (a + b - 1) // b


# ---------------------------------------------------------------------------
# Kernel: one batch tile through all three layers. Weights and the packed
# bias tile use constant index_maps so Pallas keeps them VMEM-resident across
# all grid steps (only x / out tiles stream per step).
# ---------------------------------------------------------------------------
def mlp_kernel(x_ref, w1_ref, w2_ref, w3_ref, b_ref, o_ref):
    # Static slices of the packed bias buffer (rows 0/1/2 -> b1/b2/b3), f32.
    b1 = b_ref[0:1, : w1_ref.shape[1]]
    b2 = b_ref[1:2, : w2_ref.shape[1]]
    b3 = b_ref[2:3, : w3_ref.shape[1]]

    # linear1 + relu  (bf16 MXU inputs, f32 accumulation, f32 epilogue).
    h1 = jnp.dot(x_ref[...], w1_ref[...], preferred_element_type=jnp.float32)
    h1 = jnp.maximum(h1 + b1, 0.0)

    # linear2 + relu (intermediates downcast to bf16 for the MXU; accumulation
    # stays f32 -- documented precision tradeoff, covered by test tolerance).
    h2 = jnp.dot(h1.astype(jnp.bfloat16), w2_ref[...],
                 preferred_element_type=jnp.float32)
    h2 = jnp.maximum(h2 + b2, 0.0)

    # linear3 (no activation); bf16 store halves writeback traffic.
    out = jnp.dot(h2.astype(jnp.bfloat16), w3_ref[...],
                  preferred_element_type=jnp.float32)
    o_ref[...] = (out + b3).astype(o_ref.dtype)


# ---------------------------------------------------------------------------
# One-time parameter prep -- hoisted out of the per-call path.
# ---------------------------------------------------------------------------
def prepare_params(w1, b1, w2, b2, w3, b3):
    """Lane-pad the hidden/output feature dims to multiples of 128 and cast the
    weights to bf16 ONCE (at init). w1's contraction dim stays at c_in so the
    activation x never needs feature padding.

    Weights are stored as [in, out] (transposed vs. PyTorch nn.Linear)."""
    c_in, c_h1 = w1.shape
    c_h2 = w2.shape[1]
    c_out = w3.shape[1]
    c_h1_p = _round_up(c_h1, LANE)
    c_h2_p = _round_up(c_h2, LANE)
    c_out_p = _round_up(c_out, LANE)
    fb = max(c_h1_p, c_h2_p, c_out_p)

    w1p = jnp.zeros((c_in, c_h1_p), jnp.bfloat16).at[:, :c_h1].set(
        w1.astype(jnp.bfloat16))
    w2p = jnp.zeros((c_h1_p, c_h2_p), jnp.bfloat16).at[:c_h1, :c_h2].set(
        w2.astype(jnp.bfloat16))
    w3p = jnp.zeros((c_h2_p, c_out_p), jnp.bfloat16).at[:c_h2, :c_out].set(
        w3.astype(jnp.bfloat16))
    # Pack the three (1, N) biases into one (8, fb) f32 tile -> a single DMA.
    bpack = (jnp.zeros((SUBLANE, fb), jnp.float32)
             .at[0, :c_h1].set(b1.reshape(-1))
             .at[1, :c_h2].set(b2.reshape(-1))
             .at[2, :c_out].set(b3.reshape(-1)))
    return w1p, w2p, w3p, bpack


def _choose_batch_tile(B, tm_max):
    """Batch tile: always a multiple of 8, <= tm_max, >= 2 grid steps whenever
    B > 8 (feeds both v7x TensorCores), batch padding bounded by < 8 rows."""
    tm_max = max(SUBLANE, (int(tm_max) // SUBLANE) * SUBLANE)
    if B <= SUBLANE:
        tm = SUBLANE
    else:
        n_steps = max(2, _cdiv(B, tm_max))
        tm = min(tm_max, _round_up(_cdiv(B, n_steps), SUBLANE))
    return tm, _round_up(B, tm)


@functools.partial(jax.jit, static_argnames=("c_out", "tm"))
def two_layer_relu_apply(x, w1p, w2p, w3p, bpack, *, c_out, tm=256):
    """x: [B, c_in] f32. Returns [B, c_out] f32. The whole call is one jit so
    the batch pad / bf16 cast of x and the final strip fuse with the
    pallas_call instead of making extra HBM passes."""
    B, c_in = x.shape
    c_h1_p = w1p.shape[1]
    c_h2_p = w2p.shape[1]
    c_out_p = w3p.shape[1]

    TM, B_p = _choose_batch_tile(B, tm)
    n_steps = B_p // TM

    # Un-padded feature dim; only the batch dim is padded (fused, cheap).
    xb = x.astype(jnp.bfloat16)
    if B_p != B:
        xb = jnp.zeros((B_p, c_in), jnp.bfloat16).at[:B].set(xb)

    # Explicit VMEM budget (v7x: 64 MiB physical / 32 MiB default scoped;
    # v5e default scoped is only 16 MiB). Streamed tiles are double-buffered.
    est = (2 * TM * c_in * 2                               # x tiles (bf16)
           + 2 * TM * c_out_p * 2                          # out tiles (bf16)
           + 2 * (w1p.size + w2p.size + w3p.size) * 2      # resident weights
           + 2 * bpack.size * 4                            # packed biases
           + 6 * TM * max(c_h1_p, c_h2_p, c_out_p) * 4)    # f32 intermediates
    vmem_limit = int(min(max(2 * est, 8 << 20), 48 << 20))
    # NOTE: for production hidden sizes (>= 2K features) on v7x, single-buffer
    # the constant-index weight blocks (pipeline_mode=pl.Buffered(1)) or add a
    # feature-dim grid axis with an f32 accumulator; unnecessary at these sizes.

    flops = 2 * B_p * (c_in * c_h1_p + c_h1_p * c_h2_p + c_h2_p * c_out_p)
    bytes_accessed = (B_p * c_in * 2
                      + (w1p.size + w2p.size + w3p.size) * 2
                      + bpack.size * 4
                      + B_p * c_out_p * 2)

    out_p = pl.pallas_call(
        mlp_kernel,
        out_shape=jax.ShapeDtypeStruct((B_p, c_out_p), jnp.bfloat16),
        grid=(n_steps,),
        in_specs=[
            # activations: tiled over the batch grid (last dim == full c_in).
            pl.BlockSpec((TM, c_in), lambda i: (i, 0)),
            # weights + packed biases: constant block -> VMEM-resident.
            pl.BlockSpec(w1p.shape, lambda i: (0, 0)),
            pl.BlockSpec(w2p.shape, lambda i: (0, 0)),
            pl.BlockSpec(w3p.shape, lambda i: (0, 0)),
            pl.BlockSpec(bpack.shape, lambda i: (0, 0)),
        ],
        out_specs=pl.BlockSpec((TM, c_out_p), lambda i: (i, 0)),
        compiler_params=pltpu.CompilerParams(
            dimension_semantics=("parallel",),
            vmem_limit_bytes=vmem_limit),
        cost_estimate=pl.CostEstimate(
            flops=flops, transcendentals=0, bytes_accessed=bytes_accessed),
    )(xb, w1p, w2p, w3p, bpack)

    # Strip batch padding + padded output lanes and upcast; fuses inside jit.
    return out_p[:B, :c_out].astype(jnp.float32)


def init_linear(key, fan_in, fan_out):
    """Mimics torch.nn.Linear default init (uniform +-1/sqrt(fan_in)).
    Weight returned as [fan_in, fan_out] (transposed vs. PyTorch)."""
    kw, kb = jax.random.split(key)
    bound = 1.0 / jnp.sqrt(fan_in)
    w = jax.random.uniform(kw, (fan_in, fan_out), jnp.float32, -bound, bound)
    b = jax.random.uniform(kb, (1, fan_out), jnp.float32, -bound, bound)
    return w, b


if __name__ == "__main__":
    c_in, c_hidden1, c_hidden2, c_out = 32, 64, 48, 16
    batch = 16   # > 8 so the batch grid has >= 2 steps (exercises megacore path)

    key = jax.random.PRNGKey(0)
    kx, k1, k2, k3 = jax.random.split(key, 4)

    x = jax.random.normal(kx, (batch, c_in), jnp.float32)
    w1, b1 = init_linear(k1, c_in, c_hidden1)
    w2, b2 = init_linear(k2, c_hidden1, c_hidden2)
    w3, b3 = init_linear(k3, c_hidden2, c_out)

    # One-time parameter prep (outside the per-call path).
    w1p, w2p, w3p, bpack = prepare_params(w1, b1, w2, b2, w3, b3)

    out = two_layer_relu_apply(x, w1p, w2p, w3p, bpack, c_out=c_out)
    jax.block_until_ready(out)

    # Pure-JAX f32 reference (kernel uses bf16 MXU inputs and a bf16 store ->
    # looser tolerance).
    ref = jnp.maximum(x @ w1 + b1, 0.0)
    ref = jnp.maximum(ref @ w2 + b2, 0.0)
    ref = ref @ w3 + b3

    assert out.shape == (batch, c_out)
    assert out.dtype == jnp.float32
    assert jnp.allclose(out, ref, atol=3e-2, rtol=3e-2), (
        float(jnp.max(jnp.abs(out - ref))))

    print("KERNEL_OK")
</pallas_src>

<mosaic_0001>
module attributes {stable_mosaic.version = 11 : i64} {
  func.func @mlp_kernel(%arg0: i32, %arg1: memref<8x32xbf16, #tpu.memory_space<vmem>>, %arg2: memref<32x128xbf16, #tpu.memory_space<vmem>>, %arg3: memref<128x128xbf16, #tpu.memory_space<vmem>>, %arg4: memref<128x128xbf16, #tpu.memory_space<vmem>>, %arg5: memref<8x128xf32, #tpu.memory_space<vmem>>, %arg6: memref<8x128xbf16, #tpu.memory_space<vmem>>) attributes {dimension_semantics = [#tpu.dimension_semantics<parallel>], iteration_bounds = array<i64: 2>, scalar_prefetch = 0 : i64, scratch_operands = 0 : i64, tpu.core_type = #tpu.core_type<tc>, window_params = [{transform_indices = @transform_0, window_bounds = array<i64: 8, 32>}, {pipeline_mode = #tpu.pipeline_mode<synchronous>, transform_indices = @transform_1, window_bounds = array<i64: 32, 128>}, {pipeline_mode = #tpu.pipeline_mode<synchronous>, transform_indices = @transform_2, window_bounds = array<i64: 128, 128>}, {pipeline_mode = #tpu.pipeline_mode<synchronous>, transform_indices = @transform_3, window_bounds = array<i64: 128, 128>}, {pipeline_mode = #tpu.pipeline_mode<synchronous>, transform_indices = @transform_4, window_bounds = array<i64: 8, 128>}, {transform_indices = @transform_5, window_bounds = array<i64: 8, 128>}]} {
    %c0 = arith.constant 0 : index
    %c0_0 = arith.constant 0 : index
    %0 = vector.load %arg5[%c0, %c0_0] : memref<8x128xf32, #tpu.memory_space<vmem>>, vector<1x128xf32>
    %c1 = arith.constant 1 : index
    %c0_1 = arith.constant 0 : index
    %1 = vector.load %arg5[%c1, %c0_1] : memref<8x128xf32, #tpu.memory_space<vmem>>, vector<1x128xf32>
    %c2 = arith.constant 2 : index
    %c0_2 = arith.constant 0 : index
    %2 = vector.load %arg5[%c2, %c0_2] : memref<8x128xf32, #tpu.memory_space<vmem>>, vector<1x128xf32>
    %c0_3 = arith.constant 0 : index
    %c0_4 = arith.constant 0 : index
    %3 = vector.load %arg1[%c0_3, %c0_4] : memref<8x32xbf16, #tpu.memory_space<vmem>>, vector<8x32xbf16>
    %c0_5 = arith.constant 0 : index
    %c0_6 = arith.constant 0 : index
    %4 = vector.load %arg2[%c0_5, %c0_6] : memref<32x128xbf16, #tpu.memory_space<vmem>>, vector<32x128xbf16>
    %cst = arith.constant dense<0.000000e+00> : vector<8x128xf32>
    %5 = tpu.matmul %3, %4, %cst {dimension_numbers = #tpu.dot_dimension_numbers<[1], [0], [0], [1], [0, 0, 1, 1], [], []>} : vector<8x32xbf16>, vector<32x128xbf16>, vector<8x128xf32> -> vector<8x128xf32>
    %6 = vector.broadcast %0 : vector<1x128xf32> to vector<8x128xf32>
    %7 = arith.addf %5, %6 : vector<8x128xf32>
    %cst_7 = arith.constant 0.000000e+00 : f32
    %8 = vector.broadcast %cst_7 : f32 to vector<8x128xf32>
    %9 = arith.maximumf %7, %8 : vector<8x128xf32>
    %10 = arith.truncf %9 : vector<8x128xf32> to vector<8x128xbf16>
    %c0_8 = arith.constant 0 : index
    %c0_9 = arith.constant 0 : index
    %11 = vector.load %arg3[%c0_8, %c0_9] : memref<128x128xbf16, #tpu.memory_space<vmem>>, vector<128x128xbf16>
    %cst_10 = arith.constant dense<0.000000e+00> : vector<8x128xf32>
    %12 = tpu.matmul %10, %11, %cst_10 {dimension_numbers = #tpu.dot_dimension_numbers<[1], [0], [0], [1], [0, 0, 1, 1], [], []>} : vector<8x128xbf16>, vector<128x128xbf16>, vector<8x128xf32> -> vector<8x128xf32>
    %13 = vector.broadcast %1 : vector<1x128xf32> to vector<8x128xf32>
    %14 = arith.addf %12, %13 : vector<8x128xf32>
    %cst_11 = arith.constant 0.000000e+00 : f32
    %15 = vector.broadcast %cst_11 : f32 to vector<8x128xf32>
    %16 = arith.maximumf %14, %15 : vector<8x128xf32>
    %17 = arith.truncf %16 : vector<8x128xf32> to vector<8x128xbf16>
    %c0_12 = arith.constant 0 : index
    %c0_13 = arith.constant 0 : index
    %18 = vector.load %arg4[%c0_12, %c0_13] : memref<128x128xbf16, #tpu.memory_space<vmem>>, vector<128x128xbf16>
    %cst_14 = arith.constant dense<0.000000e+00> : vector<8x128xf32>
    %19 = tpu.matmul %17, %18, %cst_14 {dimension_numbers = #tpu.dot_dimension_numbers<[1], [0], [0], [1], [0, 0, 1, 1], [], []>} : vector<8x128xbf16>, vector<128x128xbf16>, vector<8x128xf32> -> vector<8x128xf32>
    %20 = vector.broadcast %2 : vector<1x128xf32> to vector<8x128xf32>
    %21 = arith.addf %19, %20 : vector<8x128xf32>
    %22 = arith.truncf %21 : vector<8x128xf32> to vector<8x128xbf16>
    %c0_15 = arith.constant 0 : index
    %c0_16 = arith.constant 0 : index
    %23 = vector.load %arg6[%c0_15, %c0_16] : memref<8x128xbf16, #tpu.memory_space<vmem>>, vector<8x128xbf16>
    tpu.vector_store %arg6[%c0_15, %c0_16], %22 {strides = array<i32>} : memref<8x128xbf16, #tpu.memory_space<vmem>>, vector<8x128xbf16>,
    return
  }
  func.func @transform_0(%arg0: i32) -> (i32, i32) {
    %c0_i32 = arith.constant 0 : i32
    %c0_i32_0 = arith.constant 0 : i32
    return %arg0, %c0_i32 : i32, i32
  }
  func.func @transform_1(%arg0: i32) -> (i32, i32) {
    %c0_i32 = arith.constant 0 : i32
    %c0_i32_0 = arith.constant 0 : i32
    %c0_i32_1 = arith.constant 0 : i32
    return %c0_i32, %c0_i32_0 : i32, i32
  }
  func.func @transform_2(%arg0: i32) -> (i32, i32) {
    %c0_i32 = arith.constant 0 : i32
    %c0_i32_0 = arith.constant 0 : i32
    %c0_i32_1 = arith.constant 0 : i32
    return %c0_i32, %c0_i32_0 : i32, i32
  }
  func.func @transform_3(%arg0: i32) -> (i32, i32) {
    %c0_i32 = arith.constant 0 : i32
    %c0_i32_0 = arith.constant 0 : i32
    %c0_i32_1 = arith.constant 0 : i32
    return %c0_i32, %c0_i32_0 : i32, i32
  }
  func.func @transform_4(%arg0: i32) -> (i32, i32) {
    %c0_i32 = arith.constant 0 : i32
    %c0_i32_0 = arith.constant 0 : i32
    %c0_i32_1 = arith.constant 0 : i32
    return %c0_i32, %c0_i32_0 : i32, i32
  }
  func.func @transform_5(%arg0: i32) -> (i32, i32) {
    %c0_i32 = arith.constant 0 : i32
    %c0_i32_0 = arith.constant 0 : i32
    return %arg0, %c0_i32 : i32, i32
  }
}

</mosaic_0001>

<bundles_post_ra>
// kernel: two_layer_relu_apply.1
= control target key start
LH: loop header
LB: loop body
LE: loop exit
PB: predicated region body
PF: predicated region fallthrough
CT: control target
= control target key end

     0   :  { %10 = vsyncpa [#allocation3], 0  ;;  %s983_s0 = inlined_call_operand.vmem [shape: bf16[16,32], index: 0, kind: input, shape index: {}]   ;;  %s984_s1 = inlined_call_operand.vmem [shape: bf16[32,128], index: 1, kind: input, shape index: {}]   ;;  %s985_s2 = inlined_call_operand.hbm [shape: bf16[128,128], index: 2, kind: input, shape index: {}]   ;;  %s986_s3 = inlined_call_operand.hbm [shape: bf16[128,128], index: 3, kind: input, shape index: {}]   ;;  %s987_s4 = inlined_call_operand.vmem [shape: f32[8,128], index: 4, kind: input, shape index: {}]   ;;  %s988_s5 = inlined_call_operand.vmem [shape: bf16[16,128], index: 5, kind: output, shape index: {}]  }
   0x1   :  { %11 = vsyncpa [#allocation5], 0  ;;  %s875_s18 = smov 0  }
   0x2 LB: > { %s881_s19 = sadd.s32 4294967295, %s837_s18   ;;  %p618_p0 = scmp.ge.s32.totalorder %s837_s18, 1  ;;  %s837_s18 = sphi %s875_s18, %s17_s18  }
   0x3   : > { %p158_p1 = scmp.lt.s32.totalorder %s837_s18, 3  ;;  %s839_s20 = smov [#allocation2]  }
   0x4   : > { %s173_s21 = sshll.u32 %s839_s20, 4  ;;  %p735_p3 = scmp.eq.s32.totalorder %s881_s19, 0  ;;  %s174_s21 = int_to_ptr.vmem [resolvable:$true] %s173_s21 }
   0x5   : > { %p885_p2 = pnand %p618_p0, %p158_p1  ;;  %s840_s23 = smov [#allocation4]  }
   0x6   : > { %s186_s24 = sshll.u32 %s840_s23, 4  ;;  %s782_s26 = scalar_lea.vmem %s174_s21, 1024  ;;  %s187_s24 = int_to_ptr.vmem [resolvable:$true] %s186_s24 }
   0x7   : > { %p728_p4 = pneg %p885_p2  ;;  %p783_p7 = scmp.ne.s32.totalorder %s174_s21, %s782_s26 }
   0x8   : > { %p790_p10 = scmp.lt.s32.totalorder %s174_s21, %s174_s21  ;;  %p791_p11 = scmp.lt.s32.totalorder %s782_s26, %s782_s26 }
   0x9   : > { %p894_p5 = pnand %p735_p3, %p728_p4 }
   0xa   : > { %p792_p12 = por %p791_p11, %p790_p10 }
   0xb   : > { %p773_p6 = pneg %p894_p5 }
   0xd   : > { %p785_p8 = pnand %p783_p7, %p773_p6 }
   0xf   : > { %p786_p9 = pneg %p785_p8 }
  0x11   : > { %p793_p13 = pnand %p792_p12, %p786_p9 }
  0x13   : > { %796 = shalt.err (!%p793_p13)
}
  0x14   : > { %s841_s27 = smov 64   ;;  %s842_s28 = smov 4  }
  0x15   : > { %731 = dma.hbm_to_vmem [thread:$0]  (!%p894_p5), %s985_s2, 1024, %s174_s21, [#allocation3], %s841_s27, %s841_s27, %s842_s28  }
  0x16   : > { %s808_s6 = scalar_lea.vmem %s187_s24, 1024  ;;  %p816_p7 = scmp.lt.s32.totalorder %s187_s24, %s187_s24 }
  0x17   : > { %p809_p0 = scmp.ne.s32.totalorder %s187_s24, %s808_s6  ;;  %p817_p8 = scmp.lt.s32.totalorder %s808_s6, %s808_s6 }
  0x19   : > { %p811_p1 = pnand %p809_p0, %p773_p6  ;;  %p818_p10 = por %p817_p8, %p816_p7 }
  0x1b   : > { %p812_p4 = pneg %p811_p1 }
  0x1d   : > { %p819_p9 = pnand %p818_p10, %p812_p4 }
  0x1f   : > { %822 = shalt.err (!%p819_p9)
}
  0x20   : > { %734 = dma.hbm_to_vmem [thread:$0]  (!%p894_p5), %s986_s3, 1024, %s187_s24, [#allocation5], %s841_s27, %s841_s27, %s842_s28  }
  0x21   : > { %212 = sbr.rel (%p885_p2) target bundleno = 648 (0x288), region = 40 }
  0x26   : > { %828 = dma.done.wait (%p735_p3), [#allocation3], 1024  }
  0x27   : > { %830 = vsyncadd (%p735_p3), [#allocation3], 4294966272 }
  0x28   : > { %832 = dma.done.wait (%p735_p3), [#allocation5], 1024  }
  0x29   : > { %834 = vsyncadd (%p735_p3), [#allocation5], 4294966272  ;;  %p242_p6 = scmp.lt.s32.totalorder %s881_s19, 1  ;;  %v843_v0 = vmov 0.0   ;;  %vm844_vm0 = vmmov 0   ;;  %v753_v1 = vld [vmem:[%s984_s1 + $0x8] sm:$0xff]  }
  0x2a   : > { %672 = vmatprep.subr.bf16.mxu0 %v843_v0  ;;  %676 = vmatprep.mubr.msk.bf16.mxu0 %vm844_vm0, %v843_v0  ;;  %v754_v2 = vld [vmem:[%s984_s1] sm:$0xff]   ;;  %v755_v3 = vld [vmem:[#allocation2 + $0x38] sm:$0xff]   ;;  %vm275_vm1 = vcmask 261120   ;;  %v756_v4 = vld [vmem:[#allocation2 + $0x30] sm:$0xff]  }
  0x2b   : > { %680 = vmatprep.subr.bf16.mxu1 %v843_v0  ;;  %696 = vmatprep.mubr.msk.bf16.mxu1 %vm844_vm0, %v843_v0  ;;  %s992_s19 = smov (!%p242_p6, %s881_s19), 1  ;;  %v757_v6 = vld [vmem:[#allocation2 + $0x28] sm:$0xff]   ;;  %v758_v7 = vld [vmem:[#allocation2 + $0x20] sm:$0xff]   ;;  %v759_v8 = vld [vmem:[#allocation2 + $0x18] sm:$0xff]  }
  0x2c   : > { %s625_s11 = sshll.u32 %s992_s19, 2  ;;  %673 = vmatpush3.bf16.msra.mxu0 %v753_v1  ;;  %681 = vmatpush3.bf16.msra.mxu1 %v755_v3  ;;  %v760_v9 = vld [vmem:[#allocation2 + $0x10] sm:$0xff]   ;;  %v761_v10 = vld [vmem:[#allocation2 + $0x8] sm:$0xff]   ;;  %v762_v11 = vld [vmem:[#allocation2] sm:$0xff]  }
  0x2d   : > { %674 = vmatprep.subr.bf16.mxu0 %v843_v0  ;;  %s245_s16 = scalar_lea.vmem %s983_s0, %s625_s11  ;;  %682 = vmatprep.subr.bf16.mxu1 %v843_v0  ;;  %v763_v12 = vld [vmem:[#allocation4 + $0x38] sm:$0xff]   ;;  %v764_v13 = vld [vmem:[#allocation4 + $0x30] sm:$0xff]   ;;  %v765_v14 = vld [vmem:[#allocation4 + $0x28] sm:$0xff]   ;;  %s249_s27 = scalar_lea.vmem %s988_s5, %s625_s11 }
  0x2e   : > { %v254_v5 = vld [vmem:[%s245_s16] sm:$0xf]  ;;  %v767_v16 = vld [vmem:[#allocation4 + $0x18] sm:$0xff]   ;;  %v768_v17 = vld [vmem:[#allocation4 + $0x10] sm:$0xff]  }
  0x2f   : > { %v766_v15 = vld [vmem:[#allocation4 + $0x20] sm:$0xff]   ;;  %v769_v26 = vld [vmem:[#allocation4 + $0x8] sm:$0xff]  }
  0x30   : > { %675 = vmatpush3.bf16.msra.mxu0 %v754_v2  ;;  %683 = vmatpush3.bf16.msra.mxu1 %v756_v4  ;;  %v627_v18 = vld [vmem:[%s987_s4] ss:$0 sm:$0xff]  ;;  %v631_v28 = vld [vmem:[%s987_s4 + $0x1] ss:$0 sm:$0xff]  ;;  %v640_v36 = vld [vmem:[%s987_s4 + $0x2] ss:$0 sm:$0xff] }
  0x31   : > { %700 = vmatprep.subr.bf16.mxu0 %v843_v0  ;;  %684 = vmatprep.subr.bf16.mxu1 %v843_v0  ;;  %v770_v27 = vld [vmem:[#allocation4] sm:$0xff]  }
  0x33   : > { %677 = vmatmul.mubr.msk.bf16.vlgmr.msra.gmra.mxu0 %vm275_vm1, %v254_v5 }
  0x34   : > { %716 = vmatprep.mubr.msk.bf16.mxu0 %vm844_vm0, %v843_v0  ;;  %685 = vmatpush3.bf16.msra.mxu1 %v757_v6 }
  0x35   : > { %686 = vmatprep.subr.bf16.mxu1 %v843_v0  ;;  %701 = vmatpush3.bf16.msra.mxu0 %v763_v12 }
  0x36   : > { %702 = vmatprep.subr.bf16.mxu0 %v843_v0 }
  0x38   : > { %687 = vmatpush3.bf16.msra.mxu1 %v758_v7 }
  0x39   : > { %688 = vmatprep.subr.bf16.mxu1 %v843_v0  ;;  %703 = vmatpush3.bf16.msra.mxu0 %v764_v13 }
  0x3a   : > { %704 = vmatprep.subr.bf16.mxu0 %v843_v0 }
  0x3c   : > { %689 = vmatpush3.bf16.msra.mxu1 %v759_v8 }
  0x3d   : > { %690 = vmatprep.subr.bf16.mxu1 %v843_v0  ;;  %705 = vmatpush3.bf16.msra.mxu0 %v765_v14 }
  0x3e   : > { %706 = vmatprep.subr.bf16.mxu0 %v843_v0 }
  0x40   : > { %691 = vmatpush3.bf16.msra.mxu1 %v760_v9 }
  0x41   : > { %692 = vmatprep.subr.bf16.mxu1 %v843_v0  ;;  %707 = vmatpush3.bf16.msra.mxu0 %v766_v15 }
  0x42   : > { %708 = vmatprep.subr.bf16.mxu0 %v843_v0 }
  0x44   : > { %693 = vmatpush3.bf16.msra.mxu1 %v761_v10 }
  0x45   : > { %694 = vmatprep.subr.bf16.mxu1 %v843_v0  ;;  %709 = vmatpush3.bf16.msra.mxu0 %v767_v16 }
  0x46   : > { %710 = vmatprep.subr.bf16.mxu0 %v843_v0 }
  0x48   : > { %695 = vmatpush3.bf16.msra.mxu1 %v762_v11 }
  0x49   : > { %711 = vmatpush3.bf16.msra.mxu0 %v768_v17 }
  0x4a   : > { %712 = vmatprep.subr.bf16.mxu0 %v843_v0 }
  0x4d   : > { %713 = vmatpush3.bf16.msra.mxu0 %v769_v26 }
  0x4e   : > { %714 = vmatprep.subr.bf16.mxu0 %v843_v0 }
  0x51   : > { %715 = vmatpush3.bf16.msra.mxu0 %v770_v27 }
  0xf3   : > { %v313_v19 = vpop.f32.mrf.mxu0 }
  0xf4   : > { %v314_v20 = vadd.f32 %v627_v18, %v313_v19 }
  0xf5   : > { %v678_v21 = vpop.f32.mrf.mxu0 }
  0xf6   : > { %v319_v22 = vmax.f32 %v314_v20, 0.0 }
  0xf7   : > { %v316_v23 = vpop.f32.mrf.mxu0 }
  0xf8   : > { %v320_v24 = vpack.c.bf16 %v319_v22, %v319_v22 }
  0xf9   : > { %v679_v25 = vpop.f32.mrf.mxu0 }
  0xfa   : > { %697 = vmatmul.mubr.bf16.vlgmr.msra.gmra.mxu1 %v320_v24 }
 0x1ba   : > { %v423_v29 = vpop.f32.mrf.mxu1 }
 0x1bb   : > { %v424_v30 = vadd.f32 %v631_v28, %v423_v29 }
 0x1bc   : > { %v698_v31 = vpop.f32.mrf.mxu1 }
 0x1bd   : > { %v429_v32 = vmax.f32 %v424_v30, 0.0 }
 0x1be   : > { %v426_v33 = vpop.f32.mrf.mxu1 }
 0x1bf   : > { %v430_v34 = vpack.c.bf16 %v429_v32, %v429_v32 }
 0x1c0   : > { %v699_v35 = vpop.f32.mrf.mxu1 }
 0x1c1   : > { %717 = vmatmul.mubr.bf16.vlgmr.msra.gmra.mxu0 %v430_v34 }
 0x281   : > { %v533_v37 = vpop.f32.mrf.mxu0 }
 0x282   : > { %v534_v38 = vadd.f32 %v640_v36, %v533_v37 }
 0x283   : > { %v718_v39 = vpop.f32.mrf.mxu0 }
 0x284   : > { %v539_v40 = vpack.c.bf16 %v534_v38, %v534_v38 }
 0x285   : > { %v536_v41 = vpop.f32.mrf.mxu0 }
 0x286   : > { %540 = vst [vmem:[%s249_s27] sm:$0xf] %v539_v40 }
 0x287   : > { %v719_v42 = vpop.f32.mrf.mxu0 }
 0x288 PF: > { %s17_s18 = sadd.s32 1, %s837_s18  }
 0x289   : > { %p14_p2 = scmp.ge.s32.totalorder %s17_s18, 4  }
 0x28b   :  { %16 = sbr.rel (!%p14_p2) target bundleno = 2 (0x2), region = 79 }
 0x290   :  { %560 = vsyncpa [#allocation3], 1 }
 0x291   :  { %562 = vsyncpa [#allocation3 + $0x1], 1 }
 0x292   :  { %563 = vsyncpa [#allocation5], 1 }

</bundles_post_ra>
